<compile_context>
chip_gen: v6e
topology: v6e:2x2x1
jax: 0.10.0
libtpu: 0.0.40
codegen_flags: <defaults>
</compile_context>

<pallas_src>
import jax
import jax.numpy as jnp
from jax.experimental import pallas as pl
from jax.experimental.pallas import tpu as pltpu


def ffn_kernel(x_ref, w13_ref, w2_ref, o_ref, acc_ref):
    # x_ref:   (tm, D)       token tile (any float dtype; cast to bf16 here)
    # w13_ref: (D, 2*tn)     bf16 fused [gate_k | up_k] slab (leading k squeezed)
    # w2_ref:  (tn, D)       bf16 down-projection rows for H-chunk k
    # o_ref:   (tm, D)       output tile (original dtype)
    # acc_ref: (tm, D) f32   accumulator over H-chunks
    k = pl.program_id(1)

    w13 = w13_ref[...]
    x = x_ref[...].astype(w13.dtype)          # no-op if x already bf16
    tn = w13.shape[1] // 2

    # Fused gate/up projection on the MXU (bf16 in, f32 accumulate).
    h13 = jnp.dot(x, w13, preferred_element_type=jnp.float32)   # (tm, 2*tn)
    gate = h13[:, :tn]
    up = h13[:, tn:]

    # SiLU(gate) * up in f32; sigmoid via exp (EUP) + approx reciprocal (EUP,
    # ~2^-12 rel. error -- negligible for bf16 outputs).
    sig = pl.reciprocal(1.0 + jnp.exp(-gate), approx=True)
    h = (gate * sig * up).astype(w2_ref.dtype)                  # bf16 for MXU

    # Down projection for this H-chunk.
    partial = jnp.dot(h, w2_ref[...], preferred_element_type=jnp.float32)

    @pl.when(k == 0)
    def _():
        acc_ref[...] = partial            # direct store: no zero-init + +=

    @pl.when(k > 0)
    def _():
        acc_ref[...] += partial

    @pl.when(k == pl.num_programs(1) - 1)
    def _():
        o_ref[...] = acc_ref[...].astype(o_ref.dtype)


def _vmem_capacity_bytes():
    try:
        return int(pltpu.get_tpu_info().vmem_capacity_bytes)
    except Exception:
        return 64 << 20                   # conservative (v7x per-TC) fallback


def prepare_ffn_weights(w1, w2, w3, tn):
    """One-time weight prep (do this OUTSIDE the per-token hot path).

    w1, w3: (H, D)   w2: (D, H)   (PyTorch nn.Linear (out, in) layout)
    Returns:
      w13:  (kt, D, 2*tn) bf16 -- per-k CONTIGUOUS slab [w1^T chunk k | w3^T chunk k]
      w2_t: (H, D) bf16
    """
    H, D = w1.shape
    assert H % tn == 0, "hidden dim must be divisible by tn"
    assert tn % 128 == 0, "tn must be a multiple of 128 (lane-aligned split)"
    kt = H // tn
    w1_t = jnp.transpose(w1).reshape(D, kt, tn)
    w3_t = jnp.transpose(w3).reshape(D, kt, tn)
    w13 = jnp.concatenate([w1_t, w3_t], axis=2)                 # (D, kt, 2*tn)
    w13 = jnp.transpose(w13, (1, 0, 2)).astype(jnp.bfloat16)    # (kt, D, 2*tn)
    w2_t = jnp.transpose(w2).astype(jnp.bfloat16)               # (H, D)
    return w13, w2_t


def feed_forward(x, w13, w2_t, *, tm=None):
    """x: (B, S, D).  w13: (kt, D, 2*tn) bf16 (from prepare_ffn_weights).
    w2_t: (H, D) bf16.  Returns (B, S, D) in x.dtype."""
    B, S, D = x.shape
    kt, Dw, two_tn = w13.shape
    tn = two_tn // 2
    H = w2_t.shape[0]
    assert Dw == D and w2_t.shape == (H, D) and kt * tn == H
    assert tn % 128 == 0, "tn must be a multiple of 128"
    assert D % 128 == 0, "model dim must be a multiple of 128"

    vmem_cap = _vmem_capacity_bytes()
    if tm is None:
        # Arithmetic intensity w.r.t. streamed weights == tm FLOPs/byte;
        # 512 clears the v6e/v7x compute-vs-HBM break-even.
        tm = 512

    out_dtype = x.dtype
    M = B * S

    # Clamp / align the row tile: multiples of 128 when large (MXU rows),
    # multiples of 16 when small (bf16 sublane packing).
    tm_eff = min(tm, M)
    if tm_eff >= 128:
        tm_eff = (tm_eff // 128) * 128
    else:
        tm_eff = ((tm_eff + 15) // 16) * 16
    num_i = pl.cdiv(M, tm_eff)
    m_pad = num_i * tm_eff

    x2d = x.reshape(M, D)                 # cast to bf16 happens inside kernel
    if m_pad != M:
        x2d = jnp.pad(x2d, ((0, m_pad - M), (0, 0)))

    # Size the scoped VMEM limit from the actual tiles (double-buffered
    # inputs/outputs + f32 accumulator + f32 h13 intermediate), with headroom,
    # capped at the chip's real per-TC VMEM capacity minus 8 MiB.
    x_bytes = jnp.dtype(x2d.dtype).itemsize
    o_bytes = jnp.dtype(out_dtype).itemsize
    blk_bytes = (
        tm_eff * D * x_bytes        # x tile
        + D * 2 * tn * 2            # w13 slab (bf16)
        + tn * D * 2                # w2 slab (bf16)
        + tm_eff * D * o_bytes      # out tile
    )
    scratch_bytes = tm_eff * D * 4          # f32 accumulator
    h13_bytes = tm_eff * 2 * tn * 4         # f32 intermediate
    vmem_limit = 2 * blk_bytes + scratch_bytes + h13_bytes + (8 << 20)
    vmem_limit = max(vmem_limit, 16 << 20)
    vmem_limit = min(vmem_limit, vmem_cap - (8 << 20))

    # NOTE: on 128 MiB VMEM parts (v5e/v6e) pipeline_mode=pl.Buffered(3) on the
    # w13/w2 specs is a further optional tune once compute/DMA are balanced.
    out2d = pl.pallas_call(
        ffn_kernel,
        out_shape=jax.ShapeDtypeStruct((m_pad, D), out_dtype),
        grid_spec=pltpu.PrefetchScalarGridSpec(
            num_scalar_prefetch=0,
            grid=(num_i, kt),
            in_specs=[
                pl.BlockSpec((tm_eff, D), lambda i, k: (i, 0)),          # x tile
                pl.BlockSpec((pl.Squeezed(), D, 2 * tn),
                             lambda i, k: (k, 0, 0)),                    # fused w1|w3 slab
                pl.BlockSpec((tn, D), lambda i, k: (k, 0)),              # w2 rows
            ],
            out_specs=pl.BlockSpec((tm_eff, D), lambda i, k: (i, 0)),
            scratch_shapes=[pltpu.VMEM((tm_eff, D), jnp.float32)],
        ),
        compiler_params=pltpu.CompilerParams(
            dimension_semantics=("parallel", "arbitrary"),
            vmem_limit_bytes=int(vmem_limit),
        ),
    )(x2d, w13, w2_t)

    return out2d[:M].reshape(B, S, D)


def llama_hidden_dim(dim, multiple_of, ffn_dim_multiplier=None):
    hidden_dim = 4 * dim
    hidden_dim = int(2 * hidden_dim / 3)
    if ffn_dim_multiplier is not None:
        hidden_dim = int(ffn_dim_multiplier * hidden_dim)
    hidden_dim = multiple_of * ((hidden_dim + multiple_of - 1) // multiple_of)
    return hidden_dim


if __name__ == "__main__":
    # Small ModelArgs-consistent config: dim=128, multiple_of=256 -> hidden=512
    dim = 128
    multiple_of = 256
    hidden = llama_hidden_dim(dim, multiple_of)   # 512

    batch, seq = 2, 16                            # M = 32 tokens

    key = jax.random.PRNGKey(0)
    kx, k1, k2, k3 = jax.random.split(key, 4)

    x = jax.random.normal(kx, (batch, seq, dim), dtype=jnp.float32)
    # PyTorch nn.Linear weight layout: (out_features, in_features)
    w1 = jax.random.normal(k1, (hidden, dim), dtype=jnp.float32) * 0.1
    w2 = jax.random.normal(k2, (dim, hidden), dtype=jnp.float32) * 0.1
    w3 = jax.random.normal(k3, (hidden, dim), dtype=jnp.float32) * 0.1

    # Small tiles so the test exercises both grid axes (2 row tiles x 2 H-chunks).
    tn = 256
    w13, w2_t = prepare_ffn_weights(w1, w2, w3, tn)

    out = feed_forward(x, w13, w2_t, tm=16)
    out = jax.block_until_ready(out)

    # Pure-JAX reference mirroring the bf16 matmul inputs / f32 accumulation.
    xb = x.astype(jnp.bfloat16).astype(jnp.float32)
    w1b = w1.astype(jnp.bfloat16).astype(jnp.float32)
    w2b = w2.astype(jnp.bfloat16).astype(jnp.float32)
    w3b = w3.astype(jnp.bfloat16).astype(jnp.float32)
    h1 = xb @ w1b.T
    h3 = xb @ w3b.T
    h = (h1 * jax.nn.sigmoid(h1) * h3).astype(jnp.bfloat16).astype(jnp.float32)
    ref = h @ w2b.T

    assert out.shape == (batch, seq, dim)
    assert jnp.allclose(out, ref, atol=5e-2, rtol=2e-2), float(
        jnp.max(jnp.abs(out - ref)))

    print("KERNEL_OK")
</pallas_src>

<mosaic_0001>
module attributes {stable_mosaic.version = 11 : i64} {
  func.func @ffn_kernel(%arg0: i32, %arg1: i32, %arg2: memref<16x128xf32, #tpu.memory_space<vmem>>, %arg3: memref<1x128x512xbf16, #tpu.memory_space<vmem>>, %arg4: memref<256x128xbf16, #tpu.memory_space<vmem>>, %arg5: memref<16x128xf32, #tpu.memory_space<vmem>>, %arg6: memref<16x128xf32, #tpu.memory_space<vmem>>) attributes {dimension_semantics = [#tpu.dimension_semantics<parallel>, #tpu.dimension_semantics<arbitrary>], iteration_bounds = array<i64: 2, 2>, scalar_prefetch = 0 : i64, scratch_operands = 1 : i64, tpu.core_type = #tpu.core_type<tc>, window_params = [{transform_indices = @transform_0, window_bounds = array<i64: 16, 128>}, {transform_indices = @transform_1, window_bounds = array<i64: 1, 128, 512>}, {transform_indices = @transform_2, window_bounds = array<i64: 256, 128>}, {transform_indices = @transform_3, window_bounds = array<i64: 16, 128>}]} {
    %c0 = arith.constant 0 : index
    %c0_0 = arith.constant 0 : index
    %c0_1 = arith.constant 0 : index
    %0 = vector.load %arg3[%c0, %c0_0, %c0_1] : memref<1x128x512xbf16, #tpu.memory_space<vmem>>, vector<1x128x512xbf16>
    %1 = vector.shape_cast %0 : vector<1x128x512xbf16> to vector<128x512xbf16>
    %c0_2 = arith.constant 0 : index
    %c0_3 = arith.constant 0 : index
    %2 = vector.load %arg2[%c0_2, %c0_3] : memref<16x128xf32, #tpu.memory_space<vmem>>, vector<16x128xf32>
    %3 = arith.truncf %2 : vector<16x128xf32> to vector<16x128xbf16>
    %cst = arith.constant dense<0.000000e+00> : vector<16x512xf32>
    %4 = tpu.matmul %3, %1, %cst {dimension_numbers = #tpu.dot_dimension_numbers<[1], [0], [0], [1], [0, 0, 1, 1], [], []>} : vector<16x128xbf16>, vector<128x512xbf16>, vector<16x512xf32> -> vector<16x512xf32>
    %5 = vector.extract_strided_slice %4 {offsets = [0, 0], sizes = [16, 256], strides = [1, 1]} : vector<16x512xf32> to vector<16x256xf32>
    %6 = vector.extract_strided_slice %4 {offsets = [0, 256], sizes = [16, 256], strides = [1, 1]} : vector<16x512xf32> to vector<16x256xf32>
    %cst_4 = arith.constant 0.000000e+00 : f32
    %7 = vector.broadcast %cst_4 : f32 to vector<16x256xf32>
    %8 = arith.subf %7, %5 : vector<16x256xf32>
    %9 = math.exp %8 : vector<16x256xf32>
    %cst_5 = arith.constant 1.000000e+00 : f32
    %10 = vector.broadcast %cst_5 : f32 to vector<16x256xf32>
    %11 = arith.addf %10, %9 : vector<16x256xf32>
    %12 = tpu.reciprocal %11 {approx = true} : vector<16x256xf32> -> vector<16x256xf32>
    %13 = arith.mulf %5, %12 : vector<16x256xf32>
    %14 = arith.mulf %13, %6 : vector<16x256xf32>
    %15 = arith.truncf %14 : vector<16x256xf32> to vector<16x256xbf16>
    %c0_6 = arith.constant 0 : index
    %c0_7 = arith.constant 0 : index
    %16 = vector.load %arg4[%c0_6, %c0_7] : memref<256x128xbf16, #tpu.memory_space<vmem>>, vector<256x128xbf16>
    %cst_8 = arith.constant dense<0.000000e+00> : vector<16x128xf32>
    %17 = tpu.matmul %15, %16, %cst_8 {dimension_numbers = #tpu.dot_dimension_numbers<[1], [0], [0], [1], [0, 0, 1, 1], [], []>} : vector<16x256xbf16>, vector<256x128xbf16>, vector<16x128xf32> -> vector<16x128xf32>
    %c0_i32 = arith.constant 0 : i32
    %18 = arith.cmpi eq, %arg1, %c0_i32 : i32
    %19 = arith.extui %18 : i1 to i32
    %c0_i32_9 = arith.constant 0 : i32
    %20 = arith.cmpi ne, %19, %c0_i32_9 : i32
    scf.if %20 {
      %c0_13 = arith.constant 0 : index
      %c0_14 = arith.constant 0 : index
      %27 = vector.load %arg6[%c0_13, %c0_14] : memref<16x128xf32, #tpu.memory_space<vmem>>, vector<16x128xf32>
      tpu.vector_store %arg6[%c0_13, %c0_14], %17 {strides = array<i32>} : memref<16x128xf32, #tpu.memory_space<vmem>>, vector<16x128xf32>,
    } else {
    }
    %c0_i32_10 = arith.constant 0 : i32
    %21 = arith.cmpi sgt, %arg1, %c0_i32_10 : i32
    %22 = arith.extui %21 : i1 to i32
    %c0_i32_11 = arith.constant 0 : i32
    %23 = arith.cmpi ne, %22, %c0_i32_11 : i32
    scf.if %23 {
      %c0_13 = arith.constant 0 : index
      %c0_14 = arith.constant 0 : index
      %27 = vector.load %arg6[%c0_13, %c0_14] : memref<16x128xf32, #tpu.memory_space<vmem>>, vector<16x128xf32>
      %28 = arith.addf %27, %17 : vector<16x128xf32>
      %c0_15 = arith.constant 0 : index
      %c0_16 = arith.constant 0 : index
      %29 = vector.load %arg6[%c0_15, %c0_16] : memref<16x128xf32, #tpu.memory_space<vmem>>, vector<16x128xf32>
      tpu.vector_store %arg6[%c0_15, %c0_16], %28 {strides = array<i32>} : memref<16x128xf32, #tpu.memory_space<vmem>>, vector<16x128xf32>,
    } else {
    }
    %c1_i32 = arith.constant 1 : i32
    %24 = arith.cmpi eq, %arg1, %c1_i32 : i32
    %25 = arith.extui %24 : i1 to i32
    %c0_i32_12 = arith.constant 0 : i32
    %26 = arith.cmpi ne, %25, %c0_i32_12 : i32
    scf.if %26 {
      %c0_13 = arith.constant 0 : index
      %c0_14 = arith.constant 0 : index
      %27 = vector.load %arg6[%c0_13, %c0_14] : memref<16x128xf32, #tpu.memory_space<vmem>>, vector<16x128xf32>
      %c0_15 = arith.constant 0 : index
      %c0_16 = arith.constant 0 : index
      %28 = vector.load %arg5[%c0_15, %c0_16] : memref<16x128xf32, #tpu.memory_space<vmem>>, vector<16x128xf32>
      tpu.vector_store %arg5[%c0_15, %c0_16], %27 {strides = array<i32>} : memref<16x128xf32, #tpu.memory_space<vmem>>, vector<16x128xf32>,
    } else {
    }
    return
  }
  func.func @transform_0(%arg0: i32, %arg1: i32) -> (i32, i32) {
    %c0_i32 = arith.constant 0 : i32
    %c0_i32_0 = arith.constant 0 : i32
    return %arg0, %c0_i32 : i32, i32
  }
  func.func @transform_1(%arg0: i32, %arg1: i32) -> (i32, i32, i32) {
    %c0_i32 = arith.constant 0 : i32
    %c0_i32_0 = arith.constant 0 : i32
    %c0_i32_1 = arith.constant 0 : i32
    return %arg1, %c0_i32, %c0_i32_0 : i32, i32, i32
  }
  func.func @transform_2(%arg0: i32, %arg1: i32) -> (i32, i32) {
    %c0_i32 = arith.constant 0 : i32
    %c0_i32_0 = arith.constant 0 : i32
    return %arg1, %c0_i32 : i32, i32
  }
  func.func @transform_3(%arg0: i32, %arg1: i32) -> (i32, i32) {
    %c0_i32 = arith.constant 0 : i32
    %c0_i32_0 = arith.constant 0 : i32
    return %arg0, %c0_i32 : i32, i32
  }
}

</mosaic_0001>

<bundles_post_ra>
// kernel: tpu_custom_call.1
= control target key start
LH: loop header
LB: loop body
LE: loop exit
PB: predicated region body
PF: predicated region fallthrough
CT: control target
= control target key end

     0   :  { %s1786_s0 = inlined_call_operand.hbm [shape: f32[32,128], index: 0, kind: input, shape index: {}]   ;;  %s1787_s1 = inlined_call_operand.hbm [shape: bf16[2,128,512], index: 1, kind: input, shape index: {}]   ;;  %s1788_s2 = inlined_call_operand.hbm [shape: bf16[512,128], index: 2, kind: input, shape index: {}]   ;;  %s1789_s3 = inlined_call_operand.hbm [shape: f32[32,128], index: 3, kind: output, shape index: {}]  }
   0x1   :  { %1798 = sst [smem:[#allocation20_spill]] %s1786_s0 }
   0x2   :  { %1799 = sst [smem:[#allocation21_spill]] %s1787_s1 }
   0x3   :  { %1800 = sst [smem:[#allocation22_spill]] %s1789_s3 }
   0x4   :  { %8 = vsyncpa [#allocation4], 0 }
   0x5   :  { %10 = vsyncpa [#allocation4 + $0x1], 0 }
   0x6   :  { %11 = vsyncpa [#allocation7], 0 }
   0x7   :  { %13 = vsyncpa [#allocation7 + $0x1], 0 }
   0x8   :  { %14 = vsyncpa [#allocation5], 0 }
   0x9   :  { %16 = vsyncpa [#allocation5 + $0x1], 0  ;;  %s1471_s12 = smov 0   ;;  %s1473_s13 = smov 0  }
   0xa   :  { %s1475_s14 = smov 0   ;;  %s1477_s15 = smov 0  }
   0xb   :  { %s1479_s16 = smov 0   ;;  %s1481_s17 = smov 0  }
   0xc   :  { %s1483_s18 = smov 0   ;;  %s1485_s19 = smov 0  }
   0xd   :  { %s1487_s20 = smov 0   ;;  %s1489_s21 = smov 0  }
   0xe   :  { %s1491_s22 = smov 0  }
   0xf LB: > { %1801 = sst [smem:[#allocation13_spill]] %s1404_s14  ;;  %s1525_s23 = sadd.s32 4294967295, %s1436_s22   ;;  %s1436_s22 = sphi %s1491_s22, %s22_s22   ;;  %s1432_s21 = sphi %s1489_s21, %s1841_s21   ;;  %s1428_s20 = sphi %s1487_s20, %s1840_s20   ;;  %s1424_s19 = sphi %s1485_s19, %s1839_s19   ;;  %s1420_s18 = sphi %s1483_s18, %s1838_s18   ;;  %s1416_s17 = sphi %s1481_s17, %s1837_s17   ;;  %s1412_s16 = sphi %s1479_s16, %s1836_s16   ;;  %s1408_s15 = sphi %s1477_s15, %s1835_s15   ;;  %s1404_s14 = sphi %s1475_s14, %s1830_s14   ;;  %s1400_s13 = sphi %s1473_s13, %s1834_s13   ;;  %s1396_s12 = sphi %s1471_s12, %s1833_s12  }
  0x10   : > { %1802 = sst [smem:[#allocation14_spill]] %s1408_s15  ;;  %s31_s24 = sadd.s32 1, %s1428_s20 }
  0x11   : > { %1803 = sst [smem:[#allocation15_spill]] %s1420_s18  ;;  %p1528_p0 = scmp.ge.s32.totalorder %s31_s24, 2 }
  0x12   : > { %1804 = sst [smem:[#allocation16_spill]] %s1424_s19  ;;  %p49_p1 = scmp.eq.s32.totalorder %s1436_s22, 0 }
  0x13   : > { %p55_p2 = scmp.eq.s32.totalorder %s1525_s23, 0  ;;  %s67_s26 = sadd.s32 1, %s1404_s14 }
  0x14   : > { %s1843_s24 = smov (%p1528_p0, %s31_s24), 0  ;;  %p74_p3 = scmp.ne.s32.totalorder %s1404_s14, %s1400_s13 }
  0x15   : > { %1806 = sst [smem:[#allocation17_spill]] %s1843_s24  ;;  %p80_p4 = scmp.ne.s32.totalorder %s1400_s13, %s1396_s12 }
  0x16   : > { %s64_s27 = ssub.s32 %s1428_s20, %s1843_s24  ;;  %p76_p6 = por %p74_p3, %p49_p1 }
  0x17   : > { %p65_p5 = scmp.eq.s32.totalorder %s64_s27, 0  ;;  %p1548_p7 = por %p80_p4, %p55_p2 }
  0x18   : > { %p1792_p8 = scmp.lt.s32.totalorder %s1436_s22, 4  ;;  %s177_s30 = sand.u32 1, %s1436_s22  }
  0x19   : > { %s1554_s29 = scalar_select %p65_p5, %s1404_s14, %s67_s26  }
  0x1a   : > { %s179_s4 = sand.u32 1, %s1404_s14   ;;  %s1002_s6 = sshll.u32 %s1428_s20, 12 }
  0x1b   : > { %1808 = sst [smem:[#allocation18_spill]] %s1554_s29  ;;  %s934_s5 = sshll.u32 %s179_s4, 8 }
  0x1c   : > { %s1809_s1 = sld [smem:[#allocation21_spill]]  ;;  %s181_s10 = scalar_lea.vmem [#allocation6], %s934_s5 }
  0x1d   : > { %s188_s11 = sshll.u32 %s181_s10, 4  ;;  %p1564_p9 = pnand %p1792_p8, %p76_p6  ;;  %s189_s11 = int_to_ptr.vmem [resolvable:$true] %s188_s11 }
  0x1e   : > { %s937_s26 = sshll.u32 %s179_s4, 7  ;;  %s1568_s27 = scalar_lea.sflag [#allocation7], %s177_s30 }
  0x1f   : > { %p1791_p10 = pneg %p1564_p9  ;;  %s1241_s24 = scalar_lea.vmem %s189_s11, 4096 }
  0x20   : > { %p1242_p11 = scmp.ne.s32.totalorder %s189_s11, %s1241_s24  ;;  %s1438_s5 = smov [#allocation6]  }
  0x22   : > { %s187_s9 = scalar_lea.hbm %s1809_s1, %s1002_s6  ;;  %p1244_p12 = pnand %p1242_p11, %p1791_p10 }
  0x23   : > { %s1246_s6 = sshll.u32 %s1438_s5, 4  ;;  %s1247_s6 = int_to_ptr.vmem [resolvable:$false] %s1246_s6 }
  0x24   : > { %p1245_p13 = pneg %p1244_p12  ;;  %s1248_s7 = scalar_lea.vmem %s1247_s6, 8192 }
  0x25   : > { %p1249_p3 = scmp.lt.s32.totalorder %s189_s11, %s1247_s6  ;;  %p1250_p4 = scmp.lt.s32.totalorder %s1248_s7, %s1241_s24 }
  0x27   : > { %p1251_p5 = por %p1250_p4, %p1249_p3 }
  0x29   : > { %p1252_p6 = pnand %p1251_p5, %p1245_p13 }
  0x2b   : > { %1255 = shalt.err (!%p1252_p6)
}
  0x2c   : > { %s1439_s4 = smov 256   ;;  %s1440_s24 = smov 16  }
  0x2d   : > { %1041 = dma.hbm_to_vmem [thread:$0]  (!%p1564_p9), %s187_s9, 4096, %s189_s11, %s1568_s27, %s1439_s4, %s1439_s4, %s1440_s24  }
  0x2e   : > { %p940_p11 = scmp.ge.s32.totalorder %s1436_s22, 1  ;;  %s202_s30 = scalar_lea.vmem [#allocation8], %s937_s26 }
  0x2f   : > { %s1579_s8 = sshll.u32 %s202_s30, 4  ;;  %p217_p12 = scmp.lt.s32.totalorder %s1436_s22, 5  ;;  %s210_s8 = int_to_ptr.vmem [resolvable:$true] %s1579_s8 }
  0x30   : > { %s928_s5 = sadd.s32 4294967294, %s1436_s22   ;;  %s34_s6 = sadd.s32 1, %s1432_s21 }
  0x31   : > { %p1582_p13 = pnand %p940_p11, %p217_p12  ;;  %s41_s7 = sadd.s32 1, %s1416_s17 }
  0x32   : > { %s1845_s6 = smov (!%p1528_p0, %s34_s6), %s1432_s21  ;;  %p48_p3 = scmp.ne.s32.totalorder %s1416_s17, %s1412_s16 }
  0x33   : > { %p54_p4 = scmp.ne.s32.totalorder %s1412_s16, %s1408_s15  ;;  %p36_p5 = scmp.ge.s32.totalorder %s1845_s6, 2 }
  0x34   : > { %p130_p6 = scmp.eq.s32.totalorder %s1525_s23, 3  ;;  %p1599_p10 = por %p49_p1, %p48_p3 }
  0x35   : > { %p1605_p11 = por %p55_p2, %p54_p4  ;;  %s1847_s6 = smov (%p36_p5, %s1845_s6), 0 }
  0x36   : > { %1814 = sst [smem:[#allocation19_spill]] %s1847_s6  ;;  %p1611_p0 = por %p130_p6, %p48_p3 }
  0x37   : > { %p136_p12 = scmp.eq.s32.totalorder %s928_s5, 3  ;;  %s38_s26 = ssub.s32 %s1432_s21, %s1847_s6 }
  0x38   : > { %s1815_s25 = scalar_select %p1611_p0, 1, 0 }
  0x39   : > { %s156_s4 = sand.u32 1, %s1416_s17   ;;  %p39_p1 = scmp.eq.s32.totalorder %s38_s26, 0 }
  0x3a   : > { %p1618_p8 = por %p136_p12, %p54_p4  ;;  %s931_s30 = sshll.u32 %s156_s4, 4 }
  0x3b   : > { %s1623_s1 = scalar_select %p39_p1, %s1416_s17, %s41_s7  }
  0x3c   : > { %s1816_s24 = scalar_select %p1618_p8, 1, 0 }
  0x3d   : > { %s1001_s29 = sshll.u32 %s1432_s21, 8  ;;  %s1817_s0 = sld [smem:[#allocation20_spill]] }
  0x3e   : > { %s160_s19 = scalar_lea.vmem [#allocation3], %s931_s30  ;;  %p1818_p2 = scmp.lt.s32.totalorder %s1436_s22, 4 }
  0x3f   : > { %s167_s18 = sshll.u32 %s160_s19, 4  ;;  %s1003_s26 = sshll.u32 %s1428_s20, 11  ;;  %s168_s18 = int_to_ptr.vmem [resolvable:$true] %s167_s18 }
  0x40   : > { %p1633_p3 = pnand %p1818_p2, %p1599_p10  ;;  %s157_s6 = scalar_lea.sflag [#allocation4], %s156_s4 }
  0x41   : > { %s1269_s7 = scalar_lea.vmem %s168_s18, 256  ;;  %s1441_s14 = smov [#allocation3]  }
  0x42   : > { %p1258_p4 = pneg %p1633_p3  ;;  %p1270_p5 = scmp.ne.s32.totalorder %s168_s18, %s1269_s7 }
  0x43   : > { %s166_s3 = scalar_lea.hbm %s1817_s0, %s1001_s29  ;;  %s1274_s15 = sshll.u32 %s1441_s14, 4  ;;  %s1275_s15 = int_to_ptr.vmem [resolvable:$false] %s1274_s15 }
  0x44   : > { %p1272_p6 = pnand %p1270_p5, %p1258_p4  ;;  %s1276_s19 = scalar_lea.vmem %s1275_s15, 512 }
  0x45   : > { %p1277_p1 = scmp.lt.s32.totalorder %s168_s18, %s1275_s15  ;;  %p1278_p8 = scmp.lt.s32.totalorder %s1276_s19, %s1269_s7 }
  0x46   : > { %p1273_p12 = pneg %p1272_p6 }
  0x47   : > { %p1279_p0 = por %p1278_p8, %p1277_p1 }
  0x49   : > { %p1280_p10 = pnand %p1279_p0, %p1273_p12 }
  0x4b   : > { %1283 = shalt.err (!%p1280_p10)
}
  0x4c   : > { %s1442_s29 = smov 128   ;;  %s1443_s9 = smov 8  }
  0x4d   : > { %1038 = dma.hbm_to_vmem [thread:$0]  (!%p1633_p3), %s166_s3, 256, %s168_s18, %s157_s6, %s1442_s29, %s1442_s29, %s1443_s9  }
  0x4e   : > { %s208_s0 = scalar_lea.hbm %s1788_s2, %s1003_s26  ;;  %s1297_s14 = scalar_lea.vmem %s210_s8, 2048 }
  0x4f   : > { %p1298_p2 = scmp.ne.s32.totalorder %s210_s8, %s1297_s14  ;;  %p1820_p4 = pneg %p1564_p9 }
  0x50   : > { %s1444_s7 = smov [#allocation8]  }
  0x51   : > { %p1300_p5 = pnand %p1298_p2, %p1820_p4  ;;  %s1302_s15 = sshll.u32 %s1444_s7, 4  ;;  %s1303_s15 = int_to_ptr.vmem [resolvable:$false] %s1302_s15 }
  0x52   : > { %s1304_s19 = scalar_lea.vmem %s1303_s15, 4096  ;;  %p1305_p0 = scmp.lt.s32.totalorder %s210_s8, %s1303_s15 }
  0x53   : > { %p1301_p8 = pneg %p1300_p5  ;;  %p1306_p6 = scmp.lt.s32.totalorder %s1304_s19, %s1297_s14 }
  0x55   : > { %p1307_p12 = por %p1306_p6, %p1305_p0 }
  0x57   : > { %p1308_p1 = pnand %p1307_p12, %p1301_p8 }
  0x59   : > { %1311 = shalt.err (!%p1308_p1)
}
  0x5a   : > { %s1445_s3 = smov 64   ;;  %s1446_s18 = smov 4  }
  0x5b   : > { %1044 = dma.hbm_to_vmem [thread:$0]  (!%p1564_p9), %s208_s0, 2048, %s210_s8, %s1568_s27, %s1445_s3, %s1445_s3, %s1446_s18  }
  0x5c   : > { %221 = sbr.rel (%p1582_p13) target bundleno = 637 (0x27d), region = 32  ;;  %s1655_s6 = sand.u32 (!%p1582_p13), 1, %s1412_s16  }
  0x5d   : > { %s941_s5 = sshll.u32 (!%p1582_p13), %s1655_s6, 4  ;;  %s224_s26 = scalar_lea.sflag (!%p1582_p13), [#allocation4], %s1655_s6 }
  0x5e   : > { %s1661_s29 = scalar_lea.vmem (!%p1582_p13), [#allocation3], %s941_s5 }
  0x61   : > { %1383 = dma.done.wait (%p1605_p11), %s224_s26, 256  }
  0x62   : > { %1385 = vsyncadd (%p1605_p11), %s224_s26, 4294967040  ;;  %s232_s0 = sand.u32 1, %s1525_s23   ;;  %s234_s12 = sand.u32 1, %s1400_s13  }
  0x63   : > { %s942_s27 = sshll.u32 %s234_s12, 8  ;;  %s233_s8 = scalar_lea.sflag [#allocation7], %s232_s0 }
  0x64   : > { %s1671_s10 = scalar_lea.vmem [#allocation6], %s942_s27 }
  0x65   : > { %1387 = dma.done.wait (%p1548_p7), %s233_s8, 6144  }
  0x66   : > { %1389 = vsyncadd (%p1548_p7), %s233_s8, 4294961152  ;;  %v1447_v0 = vmov 0   ;;  %v1148_v1 = vld [vmem:[%s1671_s10 + $0xe4] ss:$16 sps:$4 sm:$0xff]   ;;  %v1150_v2 = vld [vmem:[%s1671_s10 + $0xe0] ss:$16 sps:$4 sm:$0xff]  }
  0x67   : > { %509 = vmatprep.mubr.bf16.mxu0 %v1447_v0  ;;  %552 = vmatprep.mubr.bf16.mxu1 %v1447_v0  ;;  %v1151_v3 = vld [vmem:[%s1671_s10 + $0xc4] ss:$16 sps:$4 sm:$0xff]   ;;  %v1153_v4 = vld [vmem:[%s1671_s10 + $0xc0] ss:$16 sps:$4 sm:$0xff]   ;;  %v1172_v9 = vld [vmem:[%s1671_s10 + $0xec] ss:$16 sps:$4 sm:$0xff]  }
  0x68   : > { %477 = vmatprep.subr.bf16.mxu0 %v1148_v1  ;;  %v1154_v5 = vld [vmem:[%s1671_s10 + $0xa4] ss:$16 sps:$4 sm:$0xff]   ;;  %v1156_v6 = vld [vmem:[%s1671_s10 + $0xa0] ss:$16 sps:$4 sm:$0xff]   ;;  %v1174_v10 = vld [vmem:[%s1671_s10 + $0xe8] ss:$16 sps:$4 sm:$0xff]   ;;  %520 = vmatprep.subr.bf16.mxu1 %v1172_v9 }
  0x69   : > { %478 = vmatpush1.bf16.msra.mxu0 %v1150_v2  ;;  %v1157_v7 = vld [vmem:[%s1671_s10 + $0x84] ss:$16 sps:$4 sm:$0xff]   ;;  %v1159_v8 = vld [vmem:[%s1671_s10 + $0x80] ss:$16 sps:$4 sm:$0xff]   ;;  %v1175_v13 = vld [vmem:[%s1671_s10 + $0xcc] ss:$16 sps:$4 sm:$0xff]   ;;  %521 = vmatpush1.bf16.msra.mxu1 %v1174_v10 }
  0x6a   : > { %479 = vmatprep.subr.bf16.mxu0 %v1151_v3  ;;  %v1160_v11 = vld [vmem:[%s1671_s10 + $0x64] ss:$16 sps:$4 sm:$0xff]   ;;  %v1162_v12 = vld [vmem:[%s1671_s10 + $0x60] ss:$16 sps:$4 sm:$0xff]   ;;  %v1177_v14 = vld [vmem:[%s1671_s10 + $0xc8] ss:$16 sps:$4 sm:$0xff]   ;;  %522 = vmatprep.subr.bf16.mxu1 %v1175_v13 }
  0x6b   : > { %v1178_v15 = vld [vmem:[%s1671_s10 + $0xac] ss:$16 sps:$4 sm:$0xff]   ;;  %v1163_v16 = vld [vmem:[%s1671_s10 + $0x44] ss:$16 sps:$4 sm:$0xff]   ;;  %v1165_v17 = vld [vmem:[%s1671_s10 + $0x40] ss:$16 sps:$4 sm:$0xff]  }
  0x6c   : > { %v1180_v18 = vld [vmem:[%s1671_s10 + $0xa8] ss:$16 sps:$4 sm:$0xff]   ;;  %v1181_v19 = vld [vmem:[%s1671_s10 + $0x8c] ss:$16 sps:$4 sm:$0xff]   ;;  %v1166_v20 = vld [vmem:[%s1671_s10 + $0x24] ss:$16 sps:$4 sm:$0xff]  }
  0x6d   : > { %480 = vmatpush1.bf16.msra.mxu0 %v1153_v4  ;;  %523 = vmatpush1.bf16.msra.mxu1 %v1177_v14  ;;  %v1183_v21 = vld [vmem:[%s1671_s10 + $0x88] ss:$16 sps:$4 sm:$0xff]   ;;  %v1168_v22 = vld [vmem:[%s1671_s10 + $0x20] ss:$16 sps:$4 sm:$0xff]   ;;  %v1184_v23 = vld [vmem:[%s1671_s10 + $0x6c] ss:$16 sps:$4 sm:$0xff]  }
  0x6e   : > { %481 = vmatprep.subr.bf16.mxu0 %v1154_v5  ;;  %524 = vmatprep.subr.bf16.mxu1 %v1178_v15  ;;  %v1169_v24 = vld [vmem:[%s1671_s10 + $0x4] ss:$16 sps:$4 sm:$0xff]   ;;  %v1171_v25 = vld [vmem:[%s1671_s10] ss:$16 sps:$4 sm:$0xff]   ;;  %v1186_v26 = vld [vmem:[%s1671_s10 + $0x68] ss:$16 sps:$4 sm:$0xff]  }
  0x6f   : > { %v314_v27 = vld [vmem:[%s1661_s29] sm:$0xff]  ;;  %v315_v28 = vld [vmem:[%s1661_s29 + $0x8] sm:$0xff]  ;;  %s943_s23 = sshll.u32 %s234_s12, 7  ;;  %s277_s11 = scalar_lea.vmem [#allocation9], %s941_s5 }
  0x70   : > { %v1187_v29 = vld [vmem:[%s1671_s10 + $0x4c] ss:$16 sps:$4 sm:$0xff]   ;;  %v316_v30 = vpack.c.bf16 %v315_v28, %v314_v27  ;;  %v1189_v31 = vld [vmem:[%s1671_s10 + $0x48] ss:$16 sps:$4 sm:$0xff]   ;;  %s245_s28 = scalar_lea.vmem [#allocation8], %s943_s23  ;;  %s1821_s9 = sld [smem:[#allocation15_spill]] }
  0x71   : > { %482 = vmatpush1.bf16.msra.mxu0 %v1156_v6  ;;  %525 = vmatpush1.bf16.msra.mxu1 %v1180_v18  ;;  %v1190_v32 = vld [vmem:[%s1671_s10 + $0x2c] ss:$16 sps:$4 sm:$0xff]   ;;  %v1192_v33 = vld [vmem:[%s1671_s10 + $0x28] ss:$16 sps:$4 sm:$0xff]   ;;  %v1198_v38 = vld [vmem:[%s245_s28 + $0x70] sm:$0xff]  }
  0x72   : > { %483 = vmatprep.subr.bf16.mxu0 %v1157_v7  ;;  %526 = vmatprep.subr.bf16.mxu1 %v1181_v19  ;;  %v1193_v34 = vld [vmem:[%s1671_s10 + $0xc] ss:$16 sps:$4 sm:$0xff]   ;;  %v1195_v35 = vld [vmem:[%s1671_s10 + $0x8] ss:$16 sps:$4 sm:$0xff]   ;;  %v1199_v39 = vld [vmem:[%s245_s28 + $0x30] sm:$0xff]  }
  0x73   : > { %v1196_v36 = vld [vmem:[%s245_s28 + $0x78] sm:$0xff]   ;;  %v1200_v40 = vld [vmem:[%s245_s28 + $0x68] sm:$0xff]   ;;  %v1202_v42 = vld [vmem:[%s245_s28 + $0x60] sm:$0xff]  }
  0x74   : > { %v1197_v37 = vld [vmem:[%s245_s28 + $0x38] sm:$0xff]   ;;  %v1201_v41 = vld [vmem:[%s245_s28 + $0x28] sm:$0xff]   ;;  %v1203_v43 = vld [vmem:[%s245_s28 + $0x20] sm:$0xff]  }
  0x75   : > { %484 = vmatpush1.bf16.msra.mxu0 %v1159_v8  ;;  %527 = vmatpush1.bf16.msra.mxu1 %v1183_v21  ;;  %v1204_v44 = vld [vmem:[%s245_s28 + $0x58] sm:$0xff]   ;;  %v1206_v46 = vld [vmem:[%s245_s28 + $0x50] sm:$0xff]   ;;  %v1208_v48 = vld [vmem:[%s245_s28 + $0x48] sm:$0xff]  }
  0x76   : > { %485 = vmatprep.subr.bf16.mxu0 %v1160_v11  ;;  %528 = vmatprep.subr.bf16.mxu1 %v1184_v23  ;;  %v1205_v45 = vld [vmem:[%s245_s28 + $0x18] sm:$0xff]   ;;  %v1207_v47 = vld [vmem:[%s245_s28 + $0x10] sm:$0xff]   ;;  %v1209_v49 = vld [vmem:[%s245_s28 + $0x8] sm:$0xff]   ;;  %p993_p7 = scmp.ne.s32.totalorder %s1821_s9, 0 }
  0x77   : > { %v1210_v50 = vld [vmem:[%s245_s28 + $0x40] sm:$0xff]  }
  0x78   : > { %v1211_v51 = vld [vmem:[%s245_s28] sm:$0xff]  }
  0x79   : > { %486 = vmatpush1.bf16.msra.mxu0 %v1162_v12  ;;  %529 = vmatpush1.bf16.msra.mxu1 %v1186_v26 }
  0x7a   : > { %487 = vmatprep.subr.bf16.mxu0 %v1163_v16  ;;  %530 = vmatprep.subr.bf16.mxu1 %v1187_v29 }
  0x7d   : > { %488 = vmatpush1.bf16.msra.mxu0 %v1165_v17  ;;  %531 = vmatpush1.bf16.msra.mxu1 %v1189_v31 }
  0x7e   : > { %489 = vmatprep.subr.bf16.mxu0 %v1166_v20  ;;  %532 = vmatprep.subr.bf16.mxu1 %v1190_v32 }
  0x81   : > { %490 = vmatpush1.bf16.msra.mxu0 %v1168_v22  ;;  %533 = vmatpush1.bf16.msra.mxu1 %v1192_v33 }
  0x82   : > { %491 = vmatprep.subr.bf16.mxu0 %v1169_v24  ;;  %534 = vmatprep.subr.bf16.mxu1 %v1193_v34 }
  0x85   : > { %492 = vmatpush1.bf16.msra.mxu0 %v1171_v25  ;;  %535 = vmatpush1.bf16.msra.mxu1 %v1195_v35 }
  0x86   : > { %1005 = vmatprep.subr.bf16.mxu0 %v1196_v36 }
  0x88   : > { %510 = vmatmul.mubr.bf16.vlgmr.msra.gmra.mxu0 %v316_v30  ;;  %553 = vmatmul.mubr.bf16.vlgmr.msra.gmra.mxu1 %v316_v30 }
  0x89   : > { %1006 = vmatpush3.bf16.msra.mxu0 %v1197_v37 }
  0x8a   : > { %1007 = vmatprep.subr.bf16.mxu0 %v1198_v38 }
  0x8d   : > { %1008 = vmatpush3.bf16.msra.mxu0 %v1199_v39 }
  0x8e   : > { %1009 = vmatprep.subr.bf16.mxu0 %v1200_v40 }
  0x91   : > { %1010 = vmatpush3.bf16.msra.mxu0 %v1201_v41 }
  0x92   : > { %1011 = vmatprep.subr.bf16.mxu0 %v1202_v42 }
  0x95   : > { %1012 = vmatpush3.bf16.msra.mxu0 %v1203_v43 }
  0x96   : > { %1013 = vmatprep.subr.bf16.mxu0 %v1204_v44 }
  0x99   : > { %1014 = vmatpush3.bf16.msra.mxu0 %v1205_v45 }
  0x9a   : > { %1015 = vmatprep.subr.bf16.mxu0 %v1206_v46 }
  0x9d   : > { %1016 = vmatpush3.bf16.msra.mxu0 %v1207_v47 }
  0x9e   : > { %1017 = vmatprep.subr.bf16.mxu0 %v1208_v48 }
  0xa1   : > { %1018 = vmatpush3.bf16.msra.mxu0 %v1209_v49 }
  0xa2   : > { %1019 = vmatprep.subr.bf16.mxu0 %v1210_v50 }
  0xa5   : > { %1020 = vmatpush3.bf16.msra.mxu0 %v1211_v51 }
 0x148   : > { %v511_v52 = vpop.f32.mrf.mxu0  ;;  %v554_v8 = vpop.f32.mrf.mxu1 }
 0x149   : > { %v563_v53 = vsub.f32 0.0, %v511_v52 }
 0x14a   : > { %v513_v54 = vpop.f32.mrf.mxu0  ;;  %v556_v9 = vpop.f32.mrf.mxu1 }
 0x14b   : > { %v567_v55 = vmul.f32 1.442695, %v563_v53  ;;  %v564_v56 = vsub.f32 0.0, %v513_v54 }
 0x14c   : > { %v515_v57 = vpop.f32.mrf.mxu0  ;;  %v558_v13 = vpop.f32.mrf.mxu1 }
 0x14d   : > { %1212 = vpow2.f32 %v567_v55  ;;  %v569_v58 = vmul.f32 1.442695, %v564_v56  ;;  %v565_v59 = vsub.f32 0.0, %v515_v57 }
 0x14e   : > { %v517_v60 = vpop.f32.mrf.mxu0  ;;  %v560_v20 = vpop.f32.mrf.mxu1 }
 0x14f   : > { %1214 = vpow2.f32 %v569_v58  ;;  %v571_v61 = vmul.f32 1.442695, %v565_v59  ;;  %v566_v62 = vsub.f32 0.0, %v517_v60 }
 0x151   : > { %1216 = vpow2.f32 %v571_v61  ;;  %v573_v63 = vmul.f32 1.442695, %v566_v62 }
 0x153   : > { %1218 = vpow2.f32 %v573_v63 }
 0x15a   : > { %v1213_v0 = vpop.eup %1212 }
 0x15b   : > { %v575_v2 = vadd.f32 1.0, %v1213_v0 }
 0x15c   : > { %v1215_v1 = vpop.eup %1214 }
 0x15d   : > { %v576_v3 = vadd.f32 1.0, %v1215_v1 }
 0x15e   : > { %v1217_v4 = vpop.eup %1216 }
 0x15f   : > { %1220 = vrcp.f32 %v576_v3  ;;  %v577_v5 = vadd.f32 1.0, %v1217_v4 }
 0x160   : > { %v1219_v6 = vpop.eup %1218  ;;  %1222 = vrcp.f32 %v575_v2 }
 0x161   : > { %1224 = vrcp.f32 %v577_v5  ;;  %v578_v7 = vadd.f32 1.0, %v1219_v6 }
 0x163   : > { %1226 = vrcp.f32 %v578_v7 }
 0x16c   : > { %v1221_v10 = vpop.eup %1220 }
 0x16d   : > { %v1223_v11 = vpop.eup %1222  ;;  %v584_v14 = vmul.f32 %v1221_v10, %v513_v54 }
 0x16e   : > { %v1225_v12 = vpop.eup %1224  ;;  %v583_v17 = vmul.f32 %v1223_v11, %v511_v52 }
 0x16f   : > { %v585_v15 = vmul.f32 %v1225_v12, %v515_v57  ;;  %v588_v21 = vmul.f32 %v584_v14, %v556_v9 }
 0x170   : > { %v1227_v16 = vpop.eup %1226  ;;  %v587_v23 = vmul.f32 %v583_v17, %v554_v8 }
 0x171   : > { %v586_v18 = vmul.f32 %v1227_v16, %v517_v60  ;;  %v589_v19 = vmul.f32 %v585_v15, %v558_v13 }
 0x173   : > { %v590_v22 = vmul.f32 %v586_v18, %v560_v20  ;;  %v591_v25 = vpack.c.bf16 %v589_v19, %v587_v23 }
 0x175   : > { %v592_v24 = vpack.c.bf16 %v590_v22, %v588_v21 }
 0x177   : > { %753 = vmatprep.mubr.bf16.mxu0 %v592_v24 }
 0x178   : > { %754 = vmatmul.mubr.bf16.vlgmr.msra.gmra.mxu0 %v591_v25 }
 0x238   : > { %v1021_v26 = vpop.f32.mrf.mxu0 }
 0x23a   : > { %v1022_v27 = vpop.f32.mrf.mxu0 }
 0x23b   : > { %v1023_v28 = vadd.f32 %v1022_v27, %v1021_v26  ;;  %765 = sbr.rel (%p993_p7) target bundleno = 578 (0x242), region = 48 }
 0x23c   : > { %v1024_v29 = vpop.f32.mrf.mxu0 }
 0x23e   : > { %v1025_v30 = vpop.f32.mrf.mxu0 }
 0x23f   : > { %v1026_v31 = vadd.f32 %v1025_v30, %v1024_v29 }
 0x240   : > { %766 = vst [vmem:[#allocation2] sm:$0xff] %v1023_v28 }
 0x241   : > { %767 = vst [vmem:[#allocation2 + $0x8] sm:$0xff] %v1026_v31 }
 0x242 PF: > { %s1822_s4 = sld [smem:[#allocation15_spill]] }
 0x248   : > { %p994_p9 = scmp.le.s32.totalorder %s1822_s4, 0 }
 0x24a   : > { %771 = sbr.rel (%p994_p9) target bundleno = 595 (0x253), region = 52 }
 0x24f   : > { %v772_v32 = vld [vmem:[#allocation2] sm:$0xff]  ;;  %v773_v33 = vld [vmem:[#allocation2 + $0x8] sm:$0xff] }
 0x250   : > { %v774_v34 = vadd.f32 %v1023_v28, %v772_v32  ;;  %v775_v35 = vadd.f32 %v1026_v31, %v773_v33 }
 0x252   : > { %776 = vst [vmem:[#allocation2] sm:$0xff] %v774_v34  ;;  %777 = vst [vmem:[#allocation2 + $0x8] sm:$0xff] %v775_v35 }
 0x253 PF: > { %s1823_s30 = sld [smem:[#allocation15_spill]] }
 0x259   : > { %p995_p13 = scmp.ne.s32.totalorder %s1823_s30, 1 }
 0x25b   : > { %781 = sbr.rel (%p995_p13) target bundleno = 610 (0x262), region = 56 }
 0x260   : > { %v782_v36 = vld [vmem:[#allocation2] sm:$0xff]  ;;  %v783_v37 = vld [vmem:[#allocation2 + $0x8] sm:$0xff] }
 0x261   : > { %784 = vst [vmem:[%s277_s11] sm:$0xff] %v782_v36  ;;  %785 = vst [vmem:[%s277_s11 + $0x8] sm:$0xff] %v783_v37 }
 0x262 PF: > { %s1824_s14 = sld [smem:[#allocation16_spill]]  ;;  %s800_s5 = sshll.u32 %s277_s11, 4  ;;  %s1724_s5 = int_to_ptr.vmem [resolvable:$true] %s800_s5 }
 0x263   : > { %s1825_s3 = sld [smem:[#allocation22_spill]]  ;;  %s787_s26 = scalar_lea.sflag [#allocation5], %s1655_s6 }
 0x264   : > { %s1312_s29 = scalar_lea.vmem %s1724_s5, 256  ;;  %p1826_p3 = scmp.ne.s32.totalorder %s1815_s25, 0 }
 0x265   : > { %p1313_p11 = scmp.ne.s32.totalorder %s1724_s5, %s1312_s29  ;;  %s1448_s0 = smov [#allocation9]  }
 0x266   : > { %s1316_s12 = sshll.u32 %s1448_s0, 4  ;;  %s1317_s12 = int_to_ptr.vmem [resolvable:$false] %s1316_s12 }
 0x267   : > { %p1314_p10 = pnand %p1313_p11, %p1826_p3  ;;  %s1318_s27 = scalar_lea.vmem %s1317_s12, 512 }
 0x268   : > { %s1004_s7 = sshll.u32 %s1824_s14, 8  ;;  %p1319_p4 = scmp.lt.s32.totalorder %s1724_s5, %s1317_s12 }
 0x269   : > { %s1722_s18 = scalar_lea.hbm %s1825_s3, %s1004_s7  ;;  %p1315_p2 = pneg %p1314_p10 }
 0x26a   : > { %p1320_p5 = scmp.lt.s32.totalorder %s1318_s27, %s1312_s29 }
 0x26c   : > { %p1321_p8 = por %p1320_p5, %p1319_p4 }
 0x26e   : > { %p1322_p0 = pnand %p1321_p8, %p1315_p2 }
 0x270   : > { %1325 = shalt.err (!%p1322_p0)
}
 0x271   : > { %s1326_s8 = scalar_lea.hbm %s1722_s18, 256  ;;  %s1330_s28 = scalar_lea.hbm %s1825_s3, 512 }
 0x272   : > { %p1327_p6 = scmp.ne.s32.totalorder %s1722_s18, %s1326_s8  ;;  %p1331_p7 = scmp.lt.s32.totalorder %s1722_s18, %s1825_s3 }
 0x273   : > { %p1332_p9 = scmp.lt.s32.totalorder %s1330_s28, %s1326_s8 }
 0x274   : > { %p1328_p12 = pnand %p1327_p6, %p1826_p3 }
 0x275   : > { %p1333_p13 = por %p1332_p9, %p1331_p7 }
 0x276   : > { %p1329_p1 = pneg %p1328_p12 }
 0x278   : > { %p1334_p11 = pnand %p1333_p13, %p1329_p1 }
 0x27a   : > { %1337 = shalt.err (!%p1334_p11)
}
 0x27b   : > { %s1449_s4 = smov 128   ;;  %s1450_s30 = smov 8  }
 0x27c   : > { %1033 = dma.vmem_to_hbm [thread:$0]  (%p1826_p3), %s1724_s5, 256, %s1722_s18, %s787_s26, %s1449_s4, %s1449_s4, %s1450_s30  }
 0x27d PF: > { %s1827_s14 = sld [smem:[#allocation14_spill]]  ;;  %p1050_p10 = scmp.ge.s32.totalorder %s1436_s22, 2 }
 0x27e   : > { %p1828_p2 = scmp.ne.s32.totalorder %s1816_s24, 0 }
 0x280   : > { %p1046_p4 = pnand %p1050_p10, %p1828_p2 }
 0x282   : > { %p1047_p5 = pneg %p1046_p4 }
 0x283   : > { %s815_s7 = sand.u32 1, %s1827_s14  }
 0x284   : > { %s816_s15 = scalar_lea.sflag [#allocation5], %s815_s7 }
 0x285   : > { %1391 = dma.done.wait (%p1047_p5), %s816_s15, 256  }
 0x286   : > { %1393 = vsyncadd (%p1047_p5), %s816_s15, 4294967040  ;;  %s22_s22 = sadd.s32 1, %s1436_s22   ;;  %s1829_s19 = sld [smem:[#allocation13_spill]] }
 0x287   : > { %p19_p8 = scmp.ge.s32.totalorder %s22_s22, 6   ;;  %s1830_s14 = sld [smem:[#allocation18_spill]] }
 0x288   : > { %s1831_s25 = sld [smem:[#allocation17_spill]]  ;;  %s1833_s12 = smov %s1400_s13 }
 0x289   : > { %s1832_s6 = sld [smem:[#allocation19_spill]]  ;;  %s1835_s15 = smov %s1412_s16 }
 0x28a   : > { %s1836_s16 = smov %s1416_s17  ;;  %s1837_s17 = smov %s1623_s1 }
 0x28b   : > { %s1838_s18 = smov %s1428_s20  ;;  %21 = sbr.rel (!%p19_p8) target bundleno = 15 (0xf), region = 113 }
 0x28c   : > { %s1834_s13 = smov %s1829_s19  ;;  %s1839_s19 = smov %s1432_s21 }
 0x28e   : > { %s1840_s20 = smov %s1831_s25 }
 0x28f   : > { %s1841_s21 = smov %s1832_s6 }
 0x290   :  { %821 = vsyncpa [#allocation4], 1 }
 0x291   :  { %823 = vsyncpa [#allocation4 + $0x1], 1 }
 0x292   :  { %824 = vsyncpa [#allocation7], 1 }
 0x293   :  { %826 = vsyncpa [#allocation7 + $0x1], 1 }
 0x294   :  { %827 = vsyncpa [#allocation5], 1 }
 0x295   :  { %829 = vsyncpa [#allocation5 + $0x1], 1 }

</bundles_post_ra>
